<compile_context>
chip_gen: v6e
topology: v6e:2x2x1
jax: 0.10.0
libtpu: 0.0.40
codegen_flags: <defaults>
</compile_context>

<pallas_src>
import functools
import math

import jax
import jax.numpy as jnp
from jax.experimental import pallas as pl
from jax.experimental.pallas import tpu as pltpu


# ----------------------------------------------------------------------------
# EMA blend kernel:  ema = decay * ema + (1 - decay) * model    (in place)
# ----------------------------------------------------------------------------

_EMA_LANES = 512        # lane-dense slab width (multiple of 128)
_EMA_TILE_ROWS = 1024   # 1024 x 512 x 4B = 2 MiB per block buffer
                        # 3 arrays x 2 pipeline buffers x 2 MiB = 12 MiB,
                        # comfortably under v7x's 32 MiB scoped-VMEM default.


def _ema_kernel(decay_ref, ema_ref, model_ref, out_ref):
    d = decay_ref[0]                       # SMEM scalar: no recompile per decay value
    out_ref[...] = d * ema_ref[...] + (1.0 - d) * model_ref[...]


def _ema_blend_pallas(ema_slab, model_slab, decay):
    rows, lanes = ema_slab.shape
    tile_rows = rows if rows <= _EMA_TILE_ROWS else _EMA_TILE_ROWS
    grid = (rows // tile_rows,)            # rows padded so this divides evenly
    decay_arr = jnp.asarray(decay, jnp.float32).reshape(1)
    return pl.pallas_call(
        _ema_kernel,
        out_shape=jax.ShapeDtypeStruct((rows, lanes), jnp.float32),
        grid=grid,
        in_specs=[
            pl.BlockSpec(memory_space=pltpu.MemorySpace.SMEM),      # decay scalar
            pl.BlockSpec((tile_rows, lanes), lambda i: (i, 0)),     # ema slab
            pl.BlockSpec((tile_rows, lanes), lambda i: (i, 0)),     # model slab
        ],
        out_specs=pl.BlockSpec((tile_rows, lanes), lambda i: (i, 0)),
        input_output_aliases={1: 0},       # update the ema slab in place
        compiler_params=pltpu.CompilerParams(
            dimension_semantics=("parallel",)),
    )(decay_arr, ema_slab, model_slab)


@functools.partial(jax.jit, donate_argnums=(0,))
def _ema_update_slab(ema_slab, model_leaves, decay):
    # Flatten the incoming live-model leaves (the one unavoidable XLA pass),
    # then blend into the persistent EMA slab in place.
    rows, lanes = ema_slab.shape
    flat = jnp.concatenate([jnp.ravel(l).astype(jnp.float32) for l in model_leaves])
    flat = jnp.pad(flat, (0, rows * lanes - flat.shape[0]))
    return _ema_blend_pallas(ema_slab, flat.reshape(rows, lanes), decay)


# ----------------------------------------------------------------------------
# Fused forward kernel: conv3x3(SAME) -> ReLU -> global avg pool -> Linear
# ----------------------------------------------------------------------------

def _round_up(v, m):
    return ((v + m - 1) // m) * m


def _fused_forward_kernel(x_ref, w1_ref, b1_ref, w2_ref, b2_ref, o_ref):
    # x_ref : [1, H+2, W+2, Cin]  one sample's padded NHWC tile (VMEM resident)
    # w1_ref: [9, Cin, CP]        conv weights, tap-major, lane-padded to CP=128
    # b1_ref: [1, CP]
    # w2_ref: [CP, NCP]           fc weights (transposed), lane-padded
    # b2_ref: [1, NCP]
    # o_ref : [1, 8, NCP]         row 0 carries the logits (dense (8,128) store)
    hp, wp, cin = x_ref.shape[1], x_ref.shape[2], x_ref.shape[3]
    h, w = hp - 2, wp - 2
    m = h * w
    cp = w1_ref.shape[-1]

    # conv3x3 as 9 shifted-window matmuls accumulated in f32 (no HBM im2col).
    acc = jnp.zeros((m, cp), jnp.float32)
    for ki in range(3):
        for kj in range(3):
            tap = x_ref[0, ki:ki + h, kj:kj + w, :]          # [H, W, Cin] VMEM window
            acc = acc + jnp.dot(tap.reshape(m, cin), w1_ref[ki * 3 + kj],
                                preferred_element_type=jnp.float32)

    feat = jnp.maximum(acc + b1_ref[...], 0.0)               # [M, 128] lane-dense ReLU

    # Global average pool as an MXU matmul (8 identical rows -> dense (8,128) tile).
    pool = jnp.full((8, m), 1.0 / m, dtype=jnp.float32)
    pooled = jnp.dot(pool, feat, preferred_element_type=jnp.float32)      # [8, CP]

    out8 = jnp.dot(pooled, w2_ref[...], preferred_element_type=jnp.float32) + b2_ref[...]
    o_ref[...] = out8[None].astype(o_ref.dtype)


def _fused_forward_pallas(xpad, w1p, b1p, w2p, b2p):
    n, hp, wp, cin = xpad.shape
    cp = w1p.shape[-1]
    ncp = w2p.shape[-1]
    return pl.pallas_call(
        _fused_forward_kernel,
        out_shape=jax.ShapeDtypeStruct((n, 8, ncp), jnp.float32),
        grid=(n,),
        in_specs=[
            pl.BlockSpec((1, hp, wp, cin), lambda i: (i, 0, 0, 0)),
            pl.BlockSpec((9, cin, cp), lambda i: (0, 0, 0)),
            pl.BlockSpec((1, cp), lambda i: (0, 0)),
            pl.BlockSpec((cp, ncp), lambda i: (0, 0)),
            pl.BlockSpec((1, ncp), lambda i: (0, 0)),
        ],
        out_specs=pl.BlockSpec((1, 8, ncp), lambda i: (i, 0, 0)),
        compiler_params=pltpu.CompilerParams(
            dimension_semantics=("parallel",)),   # shard samples across 2 TCs on v7x
    )(xpad, w1p, b1p, w2p, b2p)


@jax.jit
def model_forward(params, x_nchw):
    """Conv2d(Cin,Cout,3,pad=1) -> ReLU -> global avg pool -> Linear, NCHW input."""
    conv_w = params["conv_w"].astype(jnp.float32)       # [Cout, Cin, 3, 3]
    conv_b = params["conv_b"].astype(jnp.float32)       # [Cout]
    fc_w = params["fc_w"].astype(jnp.float32)           # [NC, Cout]
    fc_b = params["fc_b"].astype(jnp.float32)           # [NC]

    n, cin, h, w = x_nchw.shape
    cout = conv_w.shape[0]
    nc = fc_w.shape[0]
    cp = _round_up(cout, 128)     # lane-dense hidden width
    ncp = _round_up(nc, 128)      # lane-dense output width

    x = jnp.transpose(x_nchw, (0, 2, 3, 1)).astype(jnp.float32)        # NHWC
    xpad = jnp.pad(x, ((0, 0), (1, 1), (1, 1), (0, 0)))                # SAME pad

    w1 = jnp.transpose(conv_w, (2, 3, 1, 0)).reshape(9, cin, cout)     # tap-major
    w1p = jnp.pad(w1, ((0, 0), (0, 0), (0, cp - cout)))
    b1p = jnp.pad(conv_b.reshape(1, cout), ((0, 0), (0, cp - cout)))
    w2p = jnp.pad(fc_w.T, ((0, cp - cout), (0, ncp - nc)))
    b2p = jnp.pad(fc_b.reshape(1, nc), ((0, 0), (0, ncp - nc)))

    out = _fused_forward_pallas(xpad, w1p, b1p, w2p, b2p)              # [N, 8, NCP]
    return out[:, 0, :nc]


# ----------------------------------------------------------------------------
# EMAWrapper equivalent
# ----------------------------------------------------------------------------

class EMAWrapper:
    """Deep-copies the wrapped model's params into a persistent flat f32 slab and
    EMA-updates that slab in place with a tiled Pallas blend kernel."""

    def __init__(self, model_params, decay=0.9999, device=None):
        leaves, treedef = jax.tree_util.tree_flatten(model_params)
        self.decay = float(decay)
        self.device = device  # TODO(synk): explicit device placement is a no-op (single default TPU backend)
        self._treedef = treedef
        self._shapes = [tuple(l.shape) for l in leaves]
        self._dtypes = [l.dtype for l in leaves]
        self._sizes = [math.prod(s) for s in self._shapes]
        self._total = sum(self._sizes)

        rows = -(-self._total // _EMA_LANES)
        if rows > _EMA_TILE_ROWS:
            rows = -(-rows // _EMA_TILE_ROWS) * _EMA_TILE_ROWS
        self._rows = rows
        self._padded = rows * _EMA_LANES

        self._flat = self._pack(leaves)      # deep copy of model params (f32 slab)
        self._cache = None                   # lazily materialized state_dict

    # -- helpers -------------------------------------------------------------
    def _pack(self, leaves):
        flat = jnp.concatenate([jnp.ravel(l).astype(jnp.float32) for l in leaves])
        flat = jnp.pad(flat, (0, self._padded - self._total))
        return flat.reshape(self._rows, _EMA_LANES)

    def _check_tree(self, params):
        leaves, treedef = jax.tree_util.tree_flatten(params)
        if treedef != self._treedef:
            raise ValueError("EMAWrapper: parameter tree structure mismatch")
        for leaf, shape in zip(leaves, self._shapes):
            if tuple(leaf.shape) != shape:
                raise ValueError("EMAWrapper: parameter shape mismatch")
        return leaves

    # -- torch EMAWrapper API ------------------------------------------------
    def update(self, model_params):
        leaves = self._check_tree(model_params)
        self._flat = _ema_update_slab(self._flat, tuple(leaves), self.decay)
        self._cache = None

    def set(self, model_params):
        leaves = self._check_tree(model_params)
        self._flat = _ema_update_slab(self._flat, tuple(leaves), 0.0)
        self._cache = None

    def state_dict(self):
        if self._cache is None:
            flat = self._flat.reshape(-1)
            new_leaves, off = [], 0
            for shape, dtype, size in zip(self._shapes, self._dtypes, self._sizes):
                new_leaves.append(flat[off:off + size].reshape(shape).astype(dtype))
                off += size
            self._cache = jax.tree_util.tree_unflatten(self._treedef, new_leaves)
        return self._cache

    @property
    def params(self):
        return self.state_dict()

    def load_state_dict(self, state_dict):
        leaves = self._check_tree(state_dict)
        self._flat = self._pack(leaves)
        self._cache = None

    def forward(self, x):
        return model_forward(self.state_dict(), x)

    __call__ = forward


# ----------------------------------------------------------------------------
# Pure-JAX reference (correctness check)
# ----------------------------------------------------------------------------

def ref_forward(params, x_nchw):
    y = jax.lax.conv_general_dilated(
        x_nchw, params["conv_w"], window_strides=(1, 1), padding="SAME",
        dimension_numbers=("NCHW", "OIHW", "NCHW"))
    y = y + params["conv_b"][None, :, None, None]
    y = jnp.maximum(y, 0.0)
    pooled = y.mean(axis=(2, 3))
    return pooled @ params["fc_w"].T + params["fc_b"]


if __name__ == "__main__":
    key = jax.random.PRNGKey(0)
    k1, k2, k3, k4, kx = jax.random.split(key, 5)

    Cin, Cout, NUM_CLASSES = 4, 8, 16
    N, H, W = 2, 16, 16

    model_params = {
        "conv_w": 0.1 * jax.random.normal(k1, (Cout, Cin, 3, 3), jnp.float32),
        "conv_b": 0.1 * jax.random.normal(k2, (Cout,), jnp.float32),
        "fc_w": 0.1 * jax.random.normal(k3, (NUM_CLASSES, Cout), jnp.float32),
        "fc_b": 0.1 * jax.random.normal(k4, (NUM_CLASSES,), jnp.float32),
    }
    x = jax.random.normal(kx, (N, Cin, H, W), jnp.float32)

    ema = EMAWrapper(model_params, decay=0.9999)

    # simulate a training step that moved the live model's weights, then EMA-update
    updated_params = jax.tree_util.tree_map(lambda p: p + 0.01, model_params)
    ema.update(updated_params)

    # check EMA update semantics: decay*e + (1-decay)*m
    ref_ema = jax.tree_util.tree_map(
        lambda e, m: 0.9999 * e + 0.0001 * m, model_params, updated_params)
    ema_sd = ema.state_dict()
    for ka in model_params:
        assert jnp.allclose(ema_sd[ka], ref_ema[ka], rtol=1e-5, atol=1e-6), ka

    # forward pass through the EMA model (fused Pallas kernel)
    out = ema.forward(x)
    out = jax.block_until_ready(out)
    assert out.shape == (N, NUM_CLASSES)

    ref = ref_forward(ema_sd, x)
    assert jnp.allclose(out, ref, rtol=1e-3, atol=1e-3)

    # also exercise .set (copy), sharing the same compiled blend kernel (decay=0)
    ema.set(model_params)
    sd2 = ema.state_dict()
    for ka in model_params:
        assert jnp.allclose(sd2[ka], model_params[ka], rtol=1e-6, atol=1e-7), ka

    print("KERNEL_OK")
</pallas_src>

<mosaic_0001>
module attributes {stable_mosaic.version = 11 : i64} {
  func.func @_ema_kernel(%arg0: i32, %arg1: memref<1xf32, #tpu.memory_space<smem>>, %arg2: memref<1x512xf32, #tpu.memory_space<vmem>>, %arg3: memref<1x512xf32, #tpu.memory_space<vmem>>, %arg4: memref<1x512xf32, #tpu.memory_space<vmem>>) attributes {dimension_semantics = [#tpu.dimension_semantics<parallel>], iteration_bounds = array<i64: 1>, scalar_prefetch = 0 : i64, scratch_operands = 0 : i64, tpu.core_type = #tpu.core_type<tc>, window_params = [{transform_indices = @transform_0, window_bounds = array<i64: 1>}, {transform_indices = @transform_1, window_bounds = array<i64: 1, 512>}, {transform_indices = @transform_2, window_bounds = array<i64: 1, 512>}, {transform_indices = @transform_3, window_bounds = array<i64: 1, 512>}]} {
    %c0 = arith.constant 0 : index
    %0 = memref.load %arg1[%c0] : memref<1xf32, #tpu.memory_space<smem>>
    %c0_0 = arith.constant 0 : index
    %c0_1 = arith.constant 0 : index
    %1 = vector.load %arg2[%c0_0, %c0_1] : memref<1x512xf32, #tpu.memory_space<vmem>>, vector<1x512xf32>
    %2 = vector.broadcast %0 : f32 to vector<1x512xf32>
    %3 = arith.mulf %2, %1 : vector<1x512xf32>
    %cst = arith.constant 1.000000e+00 : f32
    %4 = arith.subf %cst, %0 : f32
    %c0_2 = arith.constant 0 : index
    %c0_3 = arith.constant 0 : index
    %5 = vector.load %arg3[%c0_2, %c0_3] : memref<1x512xf32, #tpu.memory_space<vmem>>, vector<1x512xf32>
    %6 = vector.broadcast %4 : f32 to vector<1x512xf32>
    %7 = arith.mulf %6, %5 : vector<1x512xf32>
    %8 = arith.addf %3, %7 : vector<1x512xf32>
    %c0_4 = arith.constant 0 : index
    %c0_5 = arith.constant 0 : index
    %9 = vector.load %arg4[%c0_4, %c0_5] : memref<1x512xf32, #tpu.memory_space<vmem>>, vector<1x512xf32>
    tpu.vector_store %arg4[%c0_4, %c0_5], %8 {strides = array<i32>} : memref<1x512xf32, #tpu.memory_space<vmem>>, vector<1x512xf32>,
    return
  }
  func.func @transform_0(%arg0: i32) -> i32 {
    %c0_i32 = arith.constant 0 : i32
    %c0_i32_0 = arith.constant 0 : i32
    return %c0_i32 : i32
  }
  func.func @transform_1(%arg0: i32) -> (i32, i32) {
    %c0_i32 = arith.constant 0 : i32
    %c0_i32_0 = arith.constant 0 : i32
    return %arg0, %c0_i32 : i32, i32
  }
  func.func @transform_2(%arg0: i32) -> (i32, i32) {
    %c0_i32 = arith.constant 0 : i32
    %c0_i32_0 = arith.constant 0 : i32
    return %arg0, %c0_i32 : i32, i32
  }
  func.func @transform_3(%arg0: i32) -> (i32, i32) {
    %c0_i32 = arith.constant 0 : i32
    %c0_i32_0 = arith.constant 0 : i32
    return %arg0, %c0_i32 : i32, i32
  }
}

</mosaic_0001>

<bundles_post_ra>
// kernel: _ema_update_slab.1
= control target key start
LH: loop header
LB: loop body
LE: loop exit
PB: predicated region body
PF: predicated region fallthrough
CT: control target
= control target key end

     0   :  { %9 = vsyncpa [#allocation4], 0  ;;  %s140_s0 = inlined_call_operand.<no memory space> [shape: f32[1], index: 0, kind: input, shape index: {}]   ;;  %s141_s1 = inlined_call_operand.hbm [shape: f32[1,512], index: 1, kind: input, shape index: {}, may-alias: {1,3}]   ;;  %s142_s2 = inlined_call_operand.vmem [shape: f32[1,512], index: 2, kind: input, shape index: {}]   ;;  %s143_s3 = inlined_call_operand.hbm [shape: f32[1,512], index: 3, kind: output, shape index: {}, may-alias: {1,3}]  }
   0x1   :  { %10 = vsyncpa [#allocation5], 0  ;;  %s103_s12 = smov [#allocation3]  }
   0x2   :  { %s19_s13 = sshll.u32 %s103_s12, 4  ;;  %s20_s13 = int_to_ptr.vmem [resolvable:$true] %s19_s13 }
   0x3   :  { %s67_s14 = scalar_lea.vmem %s20_s13, 64  ;;  %p72_p1 = scmp.lt.s32.totalorder %s20_s13, %s20_s13 }
   0x4   :  { %p68_p0 = scmp.ne.s32.totalorder %s20_s13, %s67_s14  ;;  %p73_p2 = scmp.lt.s32.totalorder %s67_s14, %s67_s14 }
   0x6   :  { %p74_p3 = por %p73_p2, %p72_p1 }
   0x8   :  { %p75_p4 = pnand %p74_p3, %p68_p0 }
   0xa   :  { %78 = shalt.err (!%p75_p4)
}
   0xb   :  { %22 = dma.hbm_to_vmem [thread:$0]  %s141_s1, 64, %s20_s13, [#allocation4]  }
   0xc   :  { %99 = dma.done.wait [#allocation4], 64  }
   0xd   :  { %100 = vsyncadd [#allocation4], 4294967232  ;;  %s32_s19 = ssub.f32 1.0, %s140_s0  ;;  %v30_v0 = vstv %s140_s0  ;;  %v37_v2 = vlaneseq  ;;  %v29_v3 = vld [vmem:[#allocation3] sm:$0xf]  ;;  %s104_s24 = smov [#allocation6]  }
   0xe   :  { %v33_v4 = vld [vmem:[%s142_s2] sm:$0xf]  ;;  %s48_s25 = sshll.u32 %s104_s24, 4  ;;  %v31_v5 = vmul.f32 %v30_v0, %v29_v3  ;;  %s49_s25 = int_to_ptr.vmem [resolvable:$true] %s48_s25 }
   0xf   :  { %v34_v1 = vstv %s32_s19  ;;  %vm39_vm0 = vcmp.lt.s32.totalorder %v37_v2, 512  ;;  %s79_s1 = scalar_lea.vmem %s49_s25, 64  ;;  %p84_p6 = scmp.lt.s32.totalorder %s49_s25, %s49_s25 }
  0x10   :  { %v35_v6 = vmul.f32 %v34_v1, %v33_v4  ;;  %p80_p5 = scmp.ne.s32.totalorder %s49_s25, %s79_s1  ;;  %p85_p7 = scmp.lt.s32.totalorder %s79_s1, %s79_s1 }
  0x12   :  { %v36_v7 = vadd.f32 %v35_v6, %v31_v5  ;;  %p86_p8 = por %p85_p7, %p84_p6 }
  0x14   :  { %41 = vst.msk [vmem:[#allocation6] sm:$0xf] %vm39_vm0, %v36_v7  ;;  %p87_p9 = pnand %p86_p8, %p80_p5 }
  0x16   :  { %90 = shalt.err (!%p87_p9)
}
  0x17   :  { %51 = dma.vmem_to_hbm [thread:$0]  %s49_s25, 64, %s143_s3, [#allocation5]  }
  0x18   :  { %101 = dma.done.wait [#allocation5], 64  }
  0x19   :  { %102 = vsyncadd [#allocation5], 4294967232 }
  0x1a   :  { %55 = vsyncpa [#allocation4], 1 }
  0x1b   :  { %56 = vsyncpa [#allocation5], 1 }

</bundles_post_ra>
